<compile_context>
chip_gen: v7x
topology: tpu7x:2x2x1
jax: 0.10.0
libtpu: 0.0.40
codegen_flags: <defaults>
</compile_context>

<pallas_src>
import jax
import jax.numpy as jnp
from jax.experimental import pallas as pl
from jax.experimental.pallas import tpu as pltpu


def _round_up(n, m):
    return ((n + m - 1) // m) * m


def _dqn_kernel(x_ref, w1_ref, b1_ref, w2_ref, b2_ref, w3_ref, b3_ref,
                wo_ref, bo_ref, out_ref):
    """Fused 4-layer MLP. Weights arrive lane-padded (last dim % 128 == 0) and
    in the MXU compute dtype (bf16); accumulation / bias-add / ReLU are f32."""
    compute_dt = w1_ref.dtype
    x = x_ref[...].astype(compute_dt)
    h = jnp.dot(x, w1_ref[...], preferred_element_type=jnp.float32) + b1_ref[...]
    h = jnp.maximum(h, 0.0).astype(compute_dt)
    h = jnp.dot(h, w2_ref[...], preferred_element_type=jnp.float32) + b2_ref[...]
    h = jnp.maximum(h, 0.0).astype(compute_dt)
    h = jnp.dot(h, w3_ref[...], preferred_element_type=jnp.float32) + b3_ref[...]
    h = jnp.maximum(h, 0.0).astype(compute_dt)
    y = jnp.dot(h, wo_ref[...], preferred_element_type=jnp.float32) + bo_ref[...]
    out_ref[...] = y.astype(out_ref.dtype)


def prepare_params(params, *, compute_dtype=jnp.bfloat16):
    """One-time prep: zero-pad feature (lane) dims to multiples of 128 and cast
    weights to the MXU compute dtype. Biases stay f32 (added to f32 accum)."""
    w1, b1, w2, b2, w3, b3, wo, bo = params
    num_inputs, num_hidden = w1.shape
    num_outputs = wo.shape[1]
    hp = _round_up(num_hidden, 128)
    op = _round_up(num_outputs, 128)

    def pad_w(w, rows, cols):
        r, c = w.shape
        return jnp.pad(w, ((0, rows - r), (0, cols - c))).astype(compute_dtype)

    def pad_b(b, cols):
        return jnp.pad(b, ((0, 0), (0, cols - b.shape[1]))).astype(jnp.float32)

    padded = (
        pad_w(w1, num_inputs, hp), pad_b(b1, hp),
        pad_w(w2, hp, hp),         pad_b(b2, hp),
        pad_w(w3, hp, hp),         pad_b(b3, hp),
        pad_w(wo, hp, op),         pad_b(bo, op),
    )
    return padded, num_outputs


def _pick_batch_tile(batch, max_tile):
    """Pick a batch tile that (a) divides the batch (no pad -> no extra HBM
    pass over x/out), (b) keeps the sublane dim a multiple of 8 or full-extent,
    and (c) prefers >= 2 grid steps so the 'parallel' axis can shard across
    v7x's two TensorCores."""
    if batch > 128:
        for tb in (256, 128, 64, 32, 16, 8):
            if tb <= max_tile and batch % tb == 0 and batch // tb >= 2:
                return tb, 0
    if batch <= max_tile:
        return batch, 0            # single full-extent tile, no padding
    pad = (-batch) % 128           # rare fallback: pad batch to a 128-multiple
    return 128, pad


def dqn_forward(x, padded_params, num_outputs, *, block_batch=256):
    """Fused DQN forward: x:(B, num_inputs) -> (B, num_outputs).

    `padded_params` must come from prepare_params() (weights laid out (in, out),
    lane-padded, bf16; biases (1, out_padded), f32)."""
    w1, b1, w2, b2, w3, b3, wo, bo = padded_params
    batch, num_inputs = x.shape
    hp = w1.shape[1]
    op = wo.shape[1]

    tb, pad = _pick_batch_tile(batch, block_batch)
    if pad:
        # TODO(synk): a remainder tile with in-kernel masked stores would avoid
        # this extra HBM pass; only hit when no 8-multiple tile divides batch.
        x = jnp.pad(x, ((0, pad), (0, 0)))
    padded_batch = batch + pad
    nb = padded_batch // tb

    # Single-buffer the constant-index weight/bias blocks only when their
    # default double-buffered footprint is big enough to matter (real DQN
    # scale, v7x 64 MiB VMEM). At demo scale keep the Pallas defaults.
    weight_bytes = sum(p.size * p.dtype.itemsize for p in padded_params)
    single_buffer_weights = (2 * weight_bytes) > (16 << 20)

    def w_spec(shape):
        if single_buffer_weights:
            return pl.BlockSpec(shape, lambda i: (0, 0),
                                pipeline_mode=pl.Buffered(1))
        return pl.BlockSpec(shape, lambda i: (0, 0))

    batched = lambda i: (i, 0)

    w_mult = 1 if single_buffer_weights else 2
    vmem_est = (2 * tb * num_inputs * x.dtype.itemsize   # x (double-buffered)
                + 2 * tb * op * x.dtype.itemsize         # out (double-buffered)
                + w_mult * weight_bytes)
    vmem_limit = int(min(max(vmem_est * 5 // 4 + (2 << 20), 16 << 20), 64 << 20))

    out = pl.pallas_call(
        _dqn_kernel,
        out_shape=jax.ShapeDtypeStruct((padded_batch, op), x.dtype),
        grid=(nb,),
        in_specs=[
            pl.BlockSpec((tb, num_inputs), batched),
            w_spec((num_inputs, hp)), w_spec((1, hp)),
            w_spec((hp, hp)),         w_spec((1, hp)),
            w_spec((hp, hp)),         w_spec((1, hp)),
            w_spec((hp, op)),         w_spec((1, op)),
        ],
        out_specs=pl.BlockSpec((tb, op), batched),
        compiler_params=pltpu.CompilerParams(
            dimension_semantics=("parallel",),
            vmem_limit_bytes=vmem_limit,
        ),
    )(x, w1, b1, w2, b2, w3, b3, wo, bo)

    # Lane-padded output columns are exact zeros; slice them (and any batch
    # padding) off.
    return out[:batch, :num_outputs]


def _init_linear(kw, kb, fan_in, fan_out):
    # Mirrors torch.nn.Linear default init: U(-1/sqrt(fan_in), 1/sqrt(fan_in)),
    # with the weight stored pre-transposed as (in, out).
    bound = 1.0 / (fan_in ** 0.5)
    w = jax.random.uniform(kw, (fan_in, fan_out), jnp.float32, -bound, bound)
    b = jax.random.uniform(kb, (1, fan_out), jnp.float32, -bound, bound)
    return w, b


if __name__ == "__main__":
    key = jax.random.PRNGKey(0)
    keys = jax.random.split(key, 9)

    # Small shapes consistent with the DQN module:
    #   num_inputs  = sum of observation-spec dims   (e.g. 24)
    #   num_hidden  = configs.num_hidden             (e.g. 32)
    #   num_outputs = num_choice_per_dim ** act_dims (e.g. 3**2 = 9)
    # NOTE: at these sizes the kernel is pure launch/DMA overhead; real MXU
    # utilization needs B >= 1024 (and/or stacking DQN heads on a grid axis).
    batch = 2
    num_inputs = 24
    num_hidden = 32
    num_outputs = 9

    x = jax.random.normal(keys[0], (batch, num_inputs), dtype=jnp.float32)
    w1, b1 = _init_linear(keys[1], keys[2], num_inputs, num_hidden)
    w2, b2 = _init_linear(keys[3], keys[4], num_hidden, num_hidden)
    w3, b3 = _init_linear(keys[5], keys[6], num_hidden, num_hidden)
    wo, bo = _init_linear(keys[7], keys[8], num_hidden, num_outputs)
    params = (w1, b1, w2, b2, w3, b3, wo, bo)

    padded_params, n_out = prepare_params(params)

    y = dqn_forward(x, padded_params, n_out)
    jax.block_until_ready(y)

    # Reference 1: same math as the kernel (bf16 operands, f32 accumulation).
    def ref_forward_bf16(xx):
        bf = lambda a: a.astype(jnp.bfloat16)
        h = jnp.maximum(jnp.dot(bf(xx), bf(w1),
                                preferred_element_type=jnp.float32) + b1, 0.0)
        h = jnp.maximum(jnp.dot(bf(h), bf(w2),
                                preferred_element_type=jnp.float32) + b2, 0.0)
        h = jnp.maximum(jnp.dot(bf(h), bf(w3),
                                preferred_element_type=jnp.float32) + b3, 0.0)
        return jnp.dot(bf(h), bf(wo),
                       preferred_element_type=jnp.float32) + bo

    # Reference 2: the original full-f32 PyTorch semantics.
    def ref_forward_f32(xx):
        h = jnp.maximum(xx @ w1 + b1, 0.0)
        h = jnp.maximum(h @ w2 + b2, 0.0)
        h = jnp.maximum(h @ w3 + b3, 0.0)
        return h @ wo + bo

    y_bf = ref_forward_bf16(x)
    y_f32 = ref_forward_f32(x)

    assert y.shape == (batch, num_outputs)
    assert y.dtype == x.dtype
    # Tight check vs the bf16-emulated reference (same math as the kernel).
    assert bool(jnp.allclose(y, y_bf, atol=2e-3, rtol=2e-3))
    # Loose sanity check vs the full-f32 module semantics (bf16 rounding noise).
    assert bool(jnp.allclose(y, y_f32, atol=1e-1, rtol=1e-1))

    print("KERNEL_OK")
</pallas_src>

<mosaic_0001>
module attributes {stable_mosaic.version = 11 : i64} {
  func.func @_dqn_kernel(%arg0: i32, %arg1: memref<2x24xf32, #tpu.memory_space<vmem>>, %arg2: memref<24x128xbf16, #tpu.memory_space<vmem>>, %arg3: memref<1x128xf32, #tpu.memory_space<vmem>>, %arg4: memref<128x128xbf16, #tpu.memory_space<vmem>>, %arg5: memref<1x128xf32, #tpu.memory_space<vmem>>, %arg6: memref<128x128xbf16, #tpu.memory_space<vmem>>, %arg7: memref<1x128xf32, #tpu.memory_space<vmem>>, %arg8: memref<128x128xbf16, #tpu.memory_space<vmem>>, %arg9: memref<1x128xf32, #tpu.memory_space<vmem>>, %arg10: memref<2x128xf32, #tpu.memory_space<vmem>>) attributes {dimension_semantics = [#tpu.dimension_semantics<parallel>], iteration_bounds = array<i64: 1>, scalar_prefetch = 0 : i64, scratch_operands = 0 : i64, tpu.core_type = #tpu.core_type<tc>, window_params = [{transform_indices = @transform_0, window_bounds = array<i64: 2, 24>}, {pipeline_mode = #tpu.pipeline_mode<synchronous>, transform_indices = @transform_1, window_bounds = array<i64: 24, 128>}, {pipeline_mode = #tpu.pipeline_mode<synchronous>, transform_indices = @transform_2, window_bounds = array<i64: 1, 128>}, {pipeline_mode = #tpu.pipeline_mode<synchronous>, transform_indices = @transform_3, window_bounds = array<i64: 128, 128>}, {pipeline_mode = #tpu.pipeline_mode<synchronous>, transform_indices = @transform_4, window_bounds = array<i64: 1, 128>}, {pipeline_mode = #tpu.pipeline_mode<synchronous>, transform_indices = @transform_5, window_bounds = array<i64: 128, 128>}, {pipeline_mode = #tpu.pipeline_mode<synchronous>, transform_indices = @transform_6, window_bounds = array<i64: 1, 128>}, {pipeline_mode = #tpu.pipeline_mode<synchronous>, transform_indices = @transform_7, window_bounds = array<i64: 128, 128>}, {pipeline_mode = #tpu.pipeline_mode<synchronous>, transform_indices = @transform_8, window_bounds = array<i64: 1, 128>}, {transform_indices = @transform_9, window_bounds = array<i64: 2, 128>}]} {
    %c0 = arith.constant 0 : index
    %c0_0 = arith.constant 0 : index
    %0 = vector.load %arg1[%c0, %c0_0] : memref<2x24xf32, #tpu.memory_space<vmem>>, vector<2x24xf32>
    %1 = arith.truncf %0 : vector<2x24xf32> to vector<2x24xbf16>
    %c0_1 = arith.constant 0 : index
    %c0_2 = arith.constant 0 : index
    %2 = vector.load %arg2[%c0_1, %c0_2] : memref<24x128xbf16, #tpu.memory_space<vmem>>, vector<24x128xbf16>
    %cst = arith.constant dense<0.000000e+00> : vector<2x128xf32>
    %3 = tpu.matmul %1, %2, %cst {dimension_numbers = #tpu.dot_dimension_numbers<[1], [0], [0], [1], [0, 0, 1, 1], [], []>} : vector<2x24xbf16>, vector<24x128xbf16>, vector<2x128xf32> -> vector<2x128xf32>
    %c0_3 = arith.constant 0 : index
    %c0_4 = arith.constant 0 : index
    %4 = vector.load %arg3[%c0_3, %c0_4] : memref<1x128xf32, #tpu.memory_space<vmem>>, vector<1x128xf32>
    %5 = vector.broadcast %4 : vector<1x128xf32> to vector<2x128xf32>
    %6 = arith.addf %3, %5 : vector<2x128xf32>
    %cst_5 = arith.constant 0.000000e+00 : f32
    %7 = vector.broadcast %cst_5 : f32 to vector<2x128xf32>
    %8 = arith.maximumf %6, %7 : vector<2x128xf32>
    %9 = arith.truncf %8 : vector<2x128xf32> to vector<2x128xbf16>
    %c0_6 = arith.constant 0 : index
    %c0_7 = arith.constant 0 : index
    %10 = vector.load %arg4[%c0_6, %c0_7] : memref<128x128xbf16, #tpu.memory_space<vmem>>, vector<128x128xbf16>
    %cst_8 = arith.constant dense<0.000000e+00> : vector<2x128xf32>
    %11 = tpu.matmul %9, %10, %cst_8 {dimension_numbers = #tpu.dot_dimension_numbers<[1], [0], [0], [1], [0, 0, 1, 1], [], []>} : vector<2x128xbf16>, vector<128x128xbf16>, vector<2x128xf32> -> vector<2x128xf32>
    %c0_9 = arith.constant 0 : index
    %c0_10 = arith.constant 0 : index
    %12 = vector.load %arg5[%c0_9, %c0_10] : memref<1x128xf32, #tpu.memory_space<vmem>>, vector<1x128xf32>
    %13 = vector.broadcast %12 : vector<1x128xf32> to vector<2x128xf32>
    %14 = arith.addf %11, %13 : vector<2x128xf32>
    %cst_11 = arith.constant 0.000000e+00 : f32
    %15 = vector.broadcast %cst_11 : f32 to vector<2x128xf32>
    %16 = arith.maximumf %14, %15 : vector<2x128xf32>
    %17 = arith.truncf %16 : vector<2x128xf32> to vector<2x128xbf16>
    %c0_12 = arith.constant 0 : index
    %c0_13 = arith.constant 0 : index
    %18 = vector.load %arg6[%c0_12, %c0_13] : memref<128x128xbf16, #tpu.memory_space<vmem>>, vector<128x128xbf16>
    %cst_14 = arith.constant dense<0.000000e+00> : vector<2x128xf32>
    %19 = tpu.matmul %17, %18, %cst_14 {dimension_numbers = #tpu.dot_dimension_numbers<[1], [0], [0], [1], [0, 0, 1, 1], [], []>} : vector<2x128xbf16>, vector<128x128xbf16>, vector<2x128xf32> -> vector<2x128xf32>
    %c0_15 = arith.constant 0 : index
    %c0_16 = arith.constant 0 : index
    %20 = vector.load %arg7[%c0_15, %c0_16] : memref<1x128xf32, #tpu.memory_space<vmem>>, vector<1x128xf32>
    %21 = vector.broadcast %20 : vector<1x128xf32> to vector<2x128xf32>
    %22 = arith.addf %19, %21 : vector<2x128xf32>
    %cst_17 = arith.constant 0.000000e+00 : f32
    %23 = vector.broadcast %cst_17 : f32 to vector<2x128xf32>
    %24 = arith.maximumf %22, %23 : vector<2x128xf32>
    %25 = arith.truncf %24 : vector<2x128xf32> to vector<2x128xbf16>
    %c0_18 = arith.constant 0 : index
    %c0_19 = arith.constant 0 : index
    %26 = vector.load %arg8[%c0_18, %c0_19] : memref<128x128xbf16, #tpu.memory_space<vmem>>, vector<128x128xbf16>
    %cst_20 = arith.constant dense<0.000000e+00> : vector<2x128xf32>
    %27 = tpu.matmul %25, %26, %cst_20 {dimension_numbers = #tpu.dot_dimension_numbers<[1], [0], [0], [1], [0, 0, 1, 1], [], []>} : vector<2x128xbf16>, vector<128x128xbf16>, vector<2x128xf32> -> vector<2x128xf32>
    %c0_21 = arith.constant 0 : index
    %c0_22 = arith.constant 0 : index
    %28 = vector.load %arg9[%c0_21, %c0_22] : memref<1x128xf32, #tpu.memory_space<vmem>>, vector<1x128xf32>
    %29 = vector.broadcast %28 : vector<1x128xf32> to vector<2x128xf32>
    %30 = arith.addf %27, %29 : vector<2x128xf32>
    %c0_23 = arith.constant 0 : index
    %c0_24 = arith.constant 0 : index
    %31 = vector.load %arg10[%c0_23, %c0_24] : memref<2x128xf32, #tpu.memory_space<vmem>>, vector<2x128xf32>
    tpu.vector_store %arg10[%c0_23, %c0_24], %30 {strides = array<i32>} : memref<2x128xf32, #tpu.memory_space<vmem>>, vector<2x128xf32>,
    return
  }
  func.func @transform_0(%arg0: i32) -> (i32, i32) {
    %c0_i32 = arith.constant 0 : i32
    %c0_i32_0 = arith.constant 0 : i32
    return %arg0, %c0_i32 : i32, i32
  }
  func.func @transform_1(%arg0: i32) -> (i32, i32) {
    %c0_i32 = arith.constant 0 : i32
    %c0_i32_0 = arith.constant 0 : i32
    %c0_i32_1 = arith.constant 0 : i32
    return %c0_i32, %c0_i32_0 : i32, i32
  }
  func.func @transform_2(%arg0: i32) -> (i32, i32) {
    %c0_i32 = arith.constant 0 : i32
    %c0_i32_0 = arith.constant 0 : i32
    %c0_i32_1 = arith.constant 0 : i32
    return %c0_i32, %c0_i32_0 : i32, i32
  }
  func.func @transform_3(%arg0: i32) -> (i32, i32) {
    %c0_i32 = arith.constant 0 : i32
    %c0_i32_0 = arith.constant 0 : i32
    %c0_i32_1 = arith.constant 0 : i32
    return %c0_i32, %c0_i32_0 : i32, i32
  }
  func.func @transform_4(%arg0: i32) -> (i32, i32) {
    %c0_i32 = arith.constant 0 : i32
    %c0_i32_0 = arith.constant 0 : i32
    %c0_i32_1 = arith.constant 0 : i32
    return %c0_i32, %c0_i32_0 : i32, i32
  }
  func.func @transform_5(%arg0: i32) -> (i32, i32) {
    %c0_i32 = arith.constant 0 : i32
    %c0_i32_0 = arith.constant 0 : i32
    %c0_i32_1 = arith.constant 0 : i32
    return %c0_i32, %c0_i32_0 : i32, i32
  }
  func.func @transform_6(%arg0: i32) -> (i32, i32) {
    %c0_i32 = arith.constant 0 : i32
    %c0_i32_0 = arith.constant 0 : i32
    %c0_i32_1 = arith.constant 0 : i32
    return %c0_i32, %c0_i32_0 : i32, i32
  }
  func.func @transform_7(%arg0: i32) -> (i32, i32) {
    %c0_i32 = arith.constant 0 : i32
    %c0_i32_0 = arith.constant 0 : i32
    %c0_i32_1 = arith.constant 0 : i32
    return %c0_i32, %c0_i32_0 : i32, i32
  }
  func.func @transform_8(%arg0: i32) -> (i32, i32) {
    %c0_i32 = arith.constant 0 : i32
    %c0_i32_0 = arith.constant 0 : i32
    %c0_i32_1 = arith.constant 0 : i32
    return %c0_i32, %c0_i32_0 : i32, i32
  }
  func.func @transform_9(%arg0: i32) -> (i32, i32) {
    %c0_i32 = arith.constant 0 : i32
    %c0_i32_0 = arith.constant 0 : i32
    return %arg0, %c0_i32 : i32, i32
  }
}

</mosaic_0001>

<bundles_post_ra>
// kernel: tpu_custom_call.1
= control target key start
LH: loop header
LB: loop body
LE: loop exit
PB: predicated region body
PF: predicated region fallthrough
CT: control target
= control target key end

     0   :  { %14 = vsyncpa [#allocation3], 0  ;;  %s1021_s0 = inlined_call_operand.hbm [shape: f32[2,24], index: 0, kind: input, shape index: {}]   ;;  %s1022_s1 = inlined_call_operand.hbm [shape: bf16[24,128], index: 1, kind: input, shape index: {}]   ;;  %s1023_s2 = inlined_call_operand.vmem [shape: f32[1,128], index: 2, kind: input, shape index: {}]   ;;  %s1024_s3 = inlined_call_operand.hbm [shape: bf16[128,128], index: 3, kind: input, shape index: {}]   ;;  %s1025_s4 = inlined_call_operand.vmem [shape: f32[1,128], index: 4, kind: input, shape index: {}]   ;;  %s1026_s5 = inlined_call_operand.hbm [shape: bf16[128,128], index: 5, kind: input, shape index: {}]   ;;  %s1027_s6 = inlined_call_operand.vmem [shape: f32[1,128], index: 6, kind: input, shape index: {}]   ;;  %s1028_s7 = inlined_call_operand.hbm [shape: bf16[128,128], index: 7, kind: input, shape index: {}]   ;;  %s1029_s8 = inlined_call_operand.vmem [shape: f32[1,128], index: 8, kind: input, shape index: {}]   ;;  %s1030_s9 = inlined_call_operand.hbm [shape: f32[2,128], index: 9, kind: output, shape index: {}]  }
   0x1   :  { %15 = vsyncpa [#allocation6], 0 }
   0x2   :  { %16 = vsyncpa [#allocation9], 0 }
   0x3   :  { %17 = vsyncpa [#allocation4], 0  ;;  %s831_s30 = smov [#allocation5]   ;;  %s691_s13 = scalar_lea.hbm %s1022_s1, 192 }
   0x4   :  { %s33_s10 = sshll.u32 %s831_s30, 4  ;;  %p692_p0 = scmp.ne.s32.totalorder %s1022_s1, %s691_s13  ;;  %s34_s10 = int_to_ptr.vmem [resolvable:$true] %s33_s10 }
   0x5   :  { %p695_p1 = scmp.lt.u32.totalorder %s691_s13, %s1022_s1 }
   0x7   :  { %p697_p2 = pnand %p695_p1, %p692_p0 }
   0x9   :  { %700 = shalt.err (!%p697_p2)
}
   0xa   :  { %s701_s18 = scalar_lea.vmem %s34_s10, 192  ;;  %p706_p4 = scmp.lt.s32.totalorder %s34_s10, %s34_s10 }
   0xb   :  { %p702_p3 = scmp.ne.s32.totalorder %s34_s10, %s701_s18  ;;  %p707_p5 = scmp.lt.s32.totalorder %s701_s18, %s701_s18 }
   0xd   :  { %p708_p6 = por %p707_p5, %p706_p4 }
   0xf   :  { %p709_p7 = pnand %p708_p6, %p702_p3 }
  0x11   :  { %712 = shalt.err (!%p709_p7)
}
  0x12   :  { %s832_s19 = smov 64   ;;  %s833_s20 = smov 4  }
  0x13   :  { %39 = dma.hbm_to_vmem [thread:$0]  %s1022_s1, 192, %s34_s10, [#allocation6], %s832_s19, %s832_s19, %s833_s20  }
  0x14   :  { %s834_s23 = smov [#allocation8]   ;;  %s835_s25 = smov [#allocation2]  }
  0x15   :  { %s61_s24 = sshll.u32 %s834_s23, 4  ;;  %s24_s26 = sshll.u32 %s835_s25, 4  ;;  %s62_s24 = int_to_ptr.vmem [resolvable:$true] %s61_s24  ;;  %s25_s26 = int_to_ptr.vmem [resolvable:$true] %s24_s26 }
  0x16   :  { %s713_s29 = scalar_lea.hbm %s1026_s5, 1024 }
  0x17   :  { %p714_p8 = scmp.ne.s32.totalorder %s1026_s5, %s713_s29  ;;  %p717_p9 = scmp.lt.u32.totalorder %s713_s29, %s1026_s5 }
  0x19   :  { %p719_p10 = pnand %p717_p9, %p714_p8 }
  0x1b   :  { %722 = shalt.err (!%p719_p10)
}
  0x1c   :  { %s723_s1 = scalar_lea.vmem %s62_s24, 1024  ;;  %p728_p12 = scmp.lt.s32.totalorder %s62_s24, %s62_s24 }
  0x1d   :  { %p724_p11 = scmp.ne.s32.totalorder %s62_s24, %s723_s1  ;;  %p729_p13 = scmp.lt.s32.totalorder %s723_s1, %s723_s1 }
  0x1f   :  { %p730_p0 = por %p729_p13, %p728_p12 }
  0x21   :  { %p731_p1 = pnand %p730_p0, %p724_p11 }
  0x23   :  { %734 = shalt.err (!%p731_p1)
}
  0x24   :  { %67 = dma.hbm_to_vmem [thread:$0]  %s1026_s5, 1024, %s62_s24, [#allocation9], %s832_s19, %s832_s19, %s833_s20  }
  0x25   :  { %s735_s17 = scalar_lea.hbm %s1021_s0, 32 }
  0x26   :  { %p736_p2 = scmp.ne.s32.totalorder %s1021_s0, %s735_s17  ;;  %p739_p3 = scmp.lt.u32.totalorder %s735_s17, %s1021_s0 }
  0x28   :  { %p741_p4 = pnand %p739_p3, %p736_p2 }
  0x2a   :  { %744 = shalt.err (!%p741_p4)
}
  0x2b   :  { %s745_s25 = scalar_lea.vmem %s25_s26, 32  ;;  %p750_p6 = scmp.lt.s32.totalorder %s25_s26, %s25_s26 }
  0x2c   :  { %p746_p5 = scmp.ne.s32.totalorder %s25_s26, %s745_s25  ;;  %p751_p7 = scmp.lt.s32.totalorder %s745_s25, %s745_s25 }
  0x2e   :  { %p752_p8 = por %p751_p7, %p750_p6 }
  0x30   :  { %p753_p9 = pnand %p752_p8, %p746_p5 }
  0x32   :  { %756 = shalt.err (!%p753_p9)
}
  0x33   :  { %27 = dma.hbm_to_vmem [thread:$0]  %s1021_s0, 32, %s25_s26, [#allocation3]  }
  0x34   :  { %s836_s27 = smov [#allocation7]   ;;  %s837_s29 = smov [#allocation10]  }
  0x35   :  { %s47_s28 = sshll.u32 %s836_s27, 4  ;;  %s75_s30 = sshll.u32 %s837_s29, 4  ;;  %s48_s28 = int_to_ptr.vmem [resolvable:$true] %s47_s28  ;;  %s76_s30 = int_to_ptr.vmem [resolvable:$true] %s75_s30 }
  0x36   :  { %s757_s13 = scalar_lea.hbm %s1024_s3, 1024 }
  0x37   :  { %p758_p10 = scmp.ne.s32.totalorder %s1024_s3, %s757_s13  ;;  %p761_p11 = scmp.lt.u32.totalorder %s757_s13, %s1024_s3 }
  0x39   :  { %p763_p12 = pnand %p761_p11, %p758_p10 }
  0x3b   :  { %766 = shalt.err (!%p763_p12)
}
  0x3c   :  { %s767_s0 = scalar_lea.vmem %s48_s28, 1024  ;;  %p772_p0 = scmp.lt.s32.totalorder %s48_s28, %s48_s28 }
  0x3d   :  { %p768_p13 = scmp.ne.s32.totalorder %s48_s28, %s767_s0  ;;  %p773_p1 = scmp.lt.s32.totalorder %s767_s0, %s767_s0 }
  0x3f   :  { %p774_p2 = por %p773_p1, %p772_p0 }
  0x41   :  { %p775_p3 = pnand %p774_p2, %p768_p13 }
  0x43   :  { %778 = shalt.err (!%p775_p3)
}
  0x44   :  { %53 = dma.hbm_to_vmem [thread:$0]  %s1024_s3, 1024, %s48_s28, [#allocation6], %s832_s19, %s832_s19, %s833_s20  }
  0x45   :  { %s779_s21 = scalar_lea.hbm %s1028_s7, 1024 }
  0x46   :  { %p780_p4 = scmp.ne.s32.totalorder %s1028_s7, %s779_s21  ;;  %p783_p5 = scmp.lt.u32.totalorder %s779_s21, %s1028_s7 }
  0x48   :  { %p785_p6 = pnand %p783_p5, %p780_p4 }
  0x4a   :  { %788 = shalt.err (!%p785_p6)
}
  0x4b   :  { %s789_s24 = scalar_lea.vmem %s76_s30, 1024  ;;  %p794_p8 = scmp.lt.s32.totalorder %s76_s30, %s76_s30 }
  0x4c   :  { %p790_p7 = scmp.ne.s32.totalorder %s76_s30, %s789_s24  ;;  %p795_p9 = scmp.lt.s32.totalorder %s789_s24, %s789_s24 }
  0x4e   :  { %p796_p10 = por %p795_p9, %p794_p8 }
  0x50   :  { %p797_p11 = pnand %p796_p10, %p790_p7 }
  0x52   :  { %800 = shalt.err (!%p797_p11)
}
  0x53   :  { %81 = dma.hbm_to_vmem [thread:$0]  %s1028_s7, 1024, %s76_s30, [#allocation9], %s832_s19, %s832_s19, %s833_s20  }
  0x54   :  { %823 = dma.done.wait [#allocation3], 32  }
  0x55   :  { %824 = vsyncadd [#allocation3], 4294967264 }
  0x56   :  { %825 = dma.done.wait [#allocation6], 1216  }
  0x57   :  { %826 = vsyncadd [#allocation6], 4294966080 }
  0x58   :  { %827 = dma.done.wait [#allocation9], 2048  }
  0x59   :  { %828 = vsyncadd [#allocation9], 4294965248  ;;  %v838_v0 = vmov 0.0   ;;  %vm839_vm0 = vmmov 0   ;;  %v665_v1 = vld [vmem:[#allocation5] sm:$0xff]   ;;  %vm125_vm1 = vcmask 1043456  }
  0x5a   :  { %587 = vmatprep.subr.bf16.mxu0 %v838_v0  ;;  %591 = vmatprep.mubr.msk.bf16.mxu0 %vm839_vm0, %v838_v0  ;;  %v666_v2 = vld [vmem:[#allocation5 + $0x8] ss:$0 sps:$4 sm:$0xff]   ;;  %v100_v3 = vld [vmem:[#allocation2] sm:$0x3]  ;;  %v667_v4 = vld [vmem:[#allocation7] sm:$0xff]   ;;  %vm121_vm2 = vcmask 195584  }
  0x5b   :  { %595 = vmatprep.subr.bf16.mxu1 %v838_v0  ;;  %611 = vmatprep.mubr.msk.bf16.mxu1 %vm839_vm0, %v838_v0  ;;  %v127_v5 = vsel %vm125_vm1, %v666_v2, 0  ;;  %v668_v6 = vld [vmem:[#allocation7 + $0x8] sm:$0xff]   ;;  %v101_v7 = vpack.c.bf16 %v100_v3, %v100_v3  ;;  %v669_v8 = vld [vmem:[#allocation7 + $0x10] sm:$0xff]   ;;  %v670_v9 = vld [vmem:[#allocation7 + $0x18] sm:$0xff]   ;;  %s840_s11 = smov [#allocation11]  }
  0x5c   :  { %588 = vmatpush3.bf16.msra.mxu0 %v665_v1  ;;  %596 = vmatpush3.bf16.msra.mxu1 %v667_v4  ;;  %v671_v10 = vld [vmem:[#allocation7 + $0x20] sm:$0xff]   ;;  %v672_v11 = vld [vmem:[#allocation7 + $0x28] sm:$0xff]   ;;  %v673_v12 = vld [vmem:[#allocation7 + $0x30] sm:$0xff]   ;;  %s515_s12 = sshll.u32 %s840_s11, 4  ;;  %s516_s12 = int_to_ptr.vmem [resolvable:$true] %s515_s12 }
  0x5d   :  { %589 = vmatprep.subr.bf16.mxu0 %v838_v0  ;;  %597 = vmatprep.subr.bf16.mxu1 %v838_v0  ;;  %v674_v13 = vld [vmem:[#allocation7 + $0x38] sm:$0xff]   ;;  %v675_v14 = vld [vmem:[#allocation8] sm:$0xff]   ;;  %v676_v15 = vld [vmem:[#allocation8 + $0x8] sm:$0xff]   ;;  %p806_p13 = scmp.lt.s32.totalorder %s516_s12, %s516_s12 }
  0x5e   :  { %v677_v16 = vld [vmem:[#allocation8 + $0x10] sm:$0xff]   ;;  %v678_v17 = vld [vmem:[#allocation8 + $0x18] sm:$0xff]   ;;  %v679_v18 = vld [vmem:[#allocation8 + $0x20] sm:$0xff]  }
  0x5f   :  { %v680_v19 = vld [vmem:[#allocation8 + $0x28] sm:$0xff]   ;;  %v526_v20 = vld [vmem:[%s1023_s2] ss:$0 sm:$0xff]  ;;  %v682_v29 = vld [vmem:[#allocation8 + $0x38] sm:$0xff]  }
  0x60   :  { %590 = vmatpush3.bf16.msra.mxu0 %v127_v5  ;;  %598 = vmatpush3.bf16.msra.mxu1 %v668_v6  ;;  %v681_v28 = vld [vmem:[#allocation8 + $0x30] sm:$0xff]   ;;  %v683_v30 = vld [vmem:[#allocation10] sm:$0xff]   ;;  %v684_v31 = vld [vmem:[#allocation10 + $0x8] sm:$0xff]  }
  0x61   :  { %615 = vmatprep.subr.bf16.mxu0 %v838_v0  ;;  %599 = vmatprep.subr.bf16.mxu1 %v838_v0  ;;  %v685_v32 = vld [vmem:[#allocation10 + $0x10] sm:$0xff]   ;;  %v686_v33 = vld [vmem:[#allocation10 + $0x18] sm:$0xff]   ;;  %v687_v34 = vld [vmem:[#allocation10 + $0x20] sm:$0xff]  }
  0x62   :  { %v688_v35 = vld [vmem:[#allocation10 + $0x28] sm:$0xff]   ;;  %v530_v36 = vld [vmem:[%s1025_s4] ss:$0 sm:$0xff]  ;;  %v690_v45 = vld [vmem:[#allocation10 + $0x38] sm:$0xff]  }
  0x63   :  { %592 = vmatmul.mubr.msk.bf16.vlgmr.msra.gmra.mrb[0].mxu0 %vm121_vm2, %v101_v7  ;;  %v689_v44 = vld [vmem:[#allocation10 + $0x30] sm:$0xff]  }
  0x64   :  { %631 = vmatprep.mubr.msk.bf16.mxu0 %vm839_vm0, %v838_v0  ;;  %600 = vmatpush3.bf16.msra.mxu1 %v669_v8  ;;  %v539_v46 = vld [vmem:[%s1027_s6] ss:$0 sm:$0xff]  ;;  %s801_s6 = scalar_lea.vmem %s516_s12, 32 }
  0x65   :  { %601 = vmatprep.subr.bf16.mxu1 %v838_v0  ;;  %616 = vmatpush3.bf16.msra.mxu0 %v675_v14  ;;  %v548_v54 = vld [vmem:[%s1029_s8] ss:$0 sm:$0xff]  ;;  %p802_p12 = scmp.ne.s32.totalorder %s516_s12, %s801_s6  ;;  %p807_p0 = scmp.lt.s32.totalorder %s801_s6, %s801_s6 }
  0x66   :  { %617 = vmatprep.subr.bf16.mxu0 %v838_v0 }
  0x67   :  { %p808_p1 = por %p807_p0, %p806_p13 }
  0x68   :  { %602 = vmatpush3.bf16.msra.mxu1 %v670_v9 }
  0x69   :  { %603 = vmatprep.subr.bf16.mxu1 %v838_v0  ;;  %618 = vmatpush3.bf16.msra.mxu0 %v676_v15  ;;  %p809_p2 = pnand %p808_p1, %p802_p12 }
  0x6a   :  { %619 = vmatprep.subr.bf16.mxu0 %v838_v0 }
  0x6c   :  { %604 = vmatpush3.bf16.msra.mxu1 %v671_v10 }
  0x6d   :  { %605 = vmatprep.subr.bf16.mxu1 %v838_v0  ;;  %620 = vmatpush3.bf16.msra.mxu0 %v677_v16 }
  0x6e   :  { %621 = vmatprep.subr.bf16.mxu0 %v838_v0 }
  0x70   :  { %606 = vmatpush3.bf16.msra.mxu1 %v672_v11 }
  0x71   :  { %607 = vmatprep.subr.bf16.mxu1 %v838_v0  ;;  %622 = vmatpush3.bf16.msra.mxu0 %v678_v17 }
  0x72   :  { %623 = vmatprep.subr.bf16.mxu0 %v838_v0 }
  0x74   :  { %608 = vmatpush3.bf16.msra.mxu1 %v673_v12 }
  0x75   :  { %609 = vmatprep.subr.bf16.mxu1 %v838_v0  ;;  %624 = vmatpush3.bf16.msra.mxu0 %v679_v18 }
  0x76   :  { %625 = vmatprep.subr.bf16.mxu0 %v838_v0 }
  0x78   :  { %610 = vmatpush3.bf16.msra.mxu1 %v674_v13 }
  0x79   :  { %635 = vmatprep.subr.bf16.mxu1 %v838_v0  ;;  %626 = vmatpush3.bf16.msra.mxu0 %v680_v19 }
  0x7a   :  { %627 = vmatprep.subr.bf16.mxu0 %v838_v0 }
  0x7d   :  { %628 = vmatpush3.bf16.msra.mxu0 %v681_v28 }
  0x7e   :  { %629 = vmatprep.subr.bf16.mxu0 %v838_v0 }
  0x81   :  { %630 = vmatpush3.bf16.msra.mxu0 %v682_v29 }
 0x136   :  { %v163_v21 = vpop.f32.mrb[0].mxu0 }
 0x137   :  { %v164_v22 = vadd.f32 %v526_v20, %v163_v21  ;;  %v593_v23 = vpop.f32.mrb[1].mxu0 }
 0x138   :  { %v166_v24 = vpop.f32.mrb[2].mxu0 }
 0x139   :  { %v169_v25 = vmax.f32 %v164_v22, 0.0  ;;  %v594_v26 = vpop.f32.mrb[3].mxu0 }
 0x13b   :  { %v170_v27 = vpack.c.bf16 %v169_v25, %v169_v25 }
 0x13d   :  { %612 = vmatmul.mubr.bf16.vlgmr.msra.gmra.mrb[0].mxu1 %v170_v27 }
 0x13e   :  { %651 = vmatprep.mubr.msk.bf16.mxu1 %vm839_vm0, %v838_v0  ;;  %636 = vmatpush3.bf16.msra.mxu1 %v683_v30 }
 0x13f   :  { %637 = vmatprep.subr.bf16.mxu1 %v838_v0 }
 0x142   :  { %638 = vmatpush3.bf16.msra.mxu1 %v684_v31 }
 0x143   :  { %639 = vmatprep.subr.bf16.mxu1 %v838_v0 }
 0x146   :  { %640 = vmatpush3.bf16.msra.mxu1 %v685_v32 }
 0x147   :  { %641 = vmatprep.subr.bf16.mxu1 %v838_v0 }
 0x14a   :  { %642 = vmatpush3.bf16.msra.mxu1 %v686_v33 }
 0x14b   :  { %643 = vmatprep.subr.bf16.mxu1 %v838_v0 }
 0x14e   :  { %644 = vmatpush3.bf16.msra.mxu1 %v687_v34 }
 0x14f   :  { %645 = vmatprep.subr.bf16.mxu1 %v838_v0 }
 0x152   :  { %646 = vmatpush3.bf16.msra.mxu1 %v688_v35 }
 0x153   :  { %647 = vmatprep.subr.bf16.mxu1 %v838_v0 }
 0x156   :  { %648 = vmatpush3.bf16.msra.mxu1 %v689_v44 }
 0x157   :  { %649 = vmatprep.subr.bf16.mxu1 %v838_v0 }
 0x15a   :  { %650 = vmatpush3.bf16.msra.mxu1 %v690_v45 }
 0x210   :  { %v276_v37 = vpop.f32.mrb[0].mxu1 }
 0x211   :  { %v277_v38 = vadd.f32 %v530_v36, %v276_v37  ;;  %v613_v39 = vpop.f32.mrb[1].mxu1 }
 0x212   :  { %v279_v40 = vpop.f32.mrb[2].mxu1 }
 0x213   :  { %v282_v41 = vmax.f32 %v277_v38, 0.0  ;;  %v614_v42 = vpop.f32.mrb[3].mxu1 }
 0x215   :  { %v283_v43 = vpack.c.bf16 %v282_v41, %v282_v41 }
 0x217   :  { %632 = vmatmul.mubr.bf16.vlgmr.msra.gmra.mrb[4].mxu0 %v283_v43 }
 0x2ea   :  { %v389_v47 = vpop.f32.mrb[4].mxu0 }
 0x2eb   :  { %v390_v48 = vadd.f32 %v539_v46, %v389_v47  ;;  %v633_v49 = vpop.f32.mrb[5].mxu0 }
 0x2ec   :  { %v392_v50 = vpop.f32.mrb[6].mxu0 }
 0x2ed   :  { %v395_v51 = vmax.f32 %v390_v48, 0.0  ;;  %v634_v52 = vpop.f32.mrb[7].mxu0 }
 0x2ef   :  { %v396_v53 = vpack.c.bf16 %v395_v51, %v395_v51 }
 0x2f1   :  { %652 = vmatmul.mubr.bf16.vlgmr.msra.gmra.mrb[4].mxu1 %v396_v53 }
 0x3c4   :  { %v502_v55 = vpop.f32.mrb[4].mxu1 }
 0x3c5   :  { %v503_v56 = vadd.f32 %v548_v54, %v502_v55  ;;  %v653_v57 = vpop.f32.mrb[5].mxu1 }
 0x3c6   :  { %v505_v58 = vpop.f32.mrb[6].mxu1 }
 0x3c7   :  { %508 = vst [vmem:[#allocation11] sm:$0x3] %v503_v56  ;;  %v654_v59 = vpop.f32.mrb[7].mxu1 }
 0x3c8   :  { %812 = shalt.err (!%p809_p2)
}
 0x3c9   :  { %s813_s8 = scalar_lea.hbm %s1030_s9, 32 }
 0x3ca   :  { %p814_p3 = scmp.ne.s32.totalorder %s1030_s9, %s813_s8  ;;  %p817_p4 = scmp.lt.u32.totalorder %s813_s8, %s1030_s9 }
 0x3cc   :  { %p819_p5 = pnand %p817_p4, %p814_p3 }
 0x3ce   :  { %822 = shalt.err (!%p819_p5)
}
 0x3cf   :  { %518 = dma.vmem_to_hbm [thread:$0]  %s516_s12, 32, %s1030_s9, [#allocation4]  }
 0x3d0   :  { %829 = dma.done.wait [#allocation4], 32  }
 0x3d1   :  { %830 = vsyncadd [#allocation4], 4294967264 }
 0x3d2   :  { %522 = vsyncpa [#allocation3], 1 }
 0x3d3   :  { %523 = vsyncpa [#allocation6], 1 }
 0x3d4   :  { %524 = vsyncpa [#allocation9], 1 }
 0x3d5   :  { %525 = vsyncpa [#allocation4], 1 }

</bundles_post_ra>
